<compile_context>
chip_gen: v6e
topology: v6e:2x2x1
jax: 0.10.0
libtpu: 0.0.40
codegen_flags: <defaults>
</compile_context>

<pallas_src>
import math

import jax
import jax.numpy as jnp
from jax.experimental import pallas as pl
from jax.experimental.pallas import tpu as pltpu


def _drop_path_kernel(x_ref, scale_ref, o_ref):
    """Broadcast per-sample scale over a (TB, TF) tile.

    x_ref     : VMEM (TB, TF)  -- flattened activations tile
    scale_ref : VMEM (TB, 1)   -- per-sample scale (0.0 or 1/keep_prob), x.dtype
    o_ref     : VMEM (TB, TF)  -- output tile
    """
    o_ref[...] = x_ref[...] * scale_ref[...]


def drop_path_pallas(x, drop_prob: float = 0.0, training: bool = False, seed: int = 0):
    """Pallas equivalent of drop_path(x, drop_prob, training)."""
    if drop_prob == 0.0 or not training:
        return x
    keep_prob = 1.0 - drop_prob

    n = x.shape[0]
    f = int(math.prod(x.shape[1:])) if x.ndim > 1 else 1

    # Per-sample Bernoulli(keep_prob) mask -> scale in {0, 1/keep_prob}.
    # Same semantics as torch: floor(keep_prob + U[0,1)), then divide by keep_prob.
    key = jax.random.PRNGKey(seed)
    u = jax.random.uniform(key, (n, 1), dtype=jnp.float32)
    scale = (jnp.floor(keep_prob + u) * jnp.float32(1.0 / keep_prob)).astype(x.dtype)

    # Flatten to a lane-dense 2D layout.
    x2 = x.reshape(n, f)

    # Tile sizes: last dim must be a multiple of 128 or equal to the full dim;
    # second-to-last must be a multiple of 8 or equal to the full dim.
    if f % 128 == 0:
        tf = min(f, 8192)          # full-width vst, ~2 MiB f32 block at tb=64
    else:
        tf = f                      # full extent (small feature dims)
    if n <= 8:
        tb = n                      # full extent
    else:
        tb = min(64, (n // 8) * 8)  # 8-aligned; partial last block handled by Pallas

    grid = (pl.cdiv(n, tb), pl.cdiv(f, tf))

    out2 = pl.pallas_call(
        _drop_path_kernel,
        out_shape=jax.ShapeDtypeStruct((n, f), x.dtype),
        grid=grid,
        in_specs=[
            pl.BlockSpec((tb, tf), lambda i, j: (i, j)),
            pl.BlockSpec((tb, 1), lambda i, j: (i, 0)),
        ],
        out_specs=pl.BlockSpec((tb, tf), lambda i, j: (i, j)),
        compiler_params=pltpu.CompilerParams(
            dimension_semantics=("parallel", "parallel")),
    )(x2, scale)

    return out2.reshape(x.shape)


class DropPath:
    """Mirror of the PyTorch DropPath module (no learnable parameters)."""

    def __init__(self, drop_prob=None):
        self.drop_prob = drop_prob if drop_prob is not None else 0.0
        self.training = True

    def __call__(self, x, seed: int = 0):
        return drop_path_pallas(x, self.drop_prob, self.training, seed=seed)


if __name__ == "__main__":
    key = jax.random.PRNGKey(0)
    x = jax.random.normal(key, (2, 4, 16, 16), dtype=jnp.float32)

    drop_prob = 0.25
    module = DropPath(drop_prob)
    module.training = True

    y = jax.block_until_ready(module(x, seed=1234))

    # Sanity checks: shape/dtype preserved; each sample is either all-zero or
    # exactly x / keep_prob (per-sample stochastic-depth semantics).
    assert y.shape == x.shape and y.dtype == x.dtype
    keep_prob = 1.0 - drop_prob
    for b in range(x.shape[0]):
        yb = y[b]
        is_dropped = bool(jnp.all(yb == 0.0))
        is_kept = bool(jnp.allclose(yb, x[b] / keep_prob, atol=1e-6, rtol=1e-6))
        assert is_dropped or is_kept

    # Eval / zero-prob path returns input unchanged.
    module.training = False
    y_eval = jax.block_until_ready(module(x))
    assert bool(jnp.all(y_eval == x))

    print("KERNEL_OK")
</pallas_src>

<mosaic_0001>
module attributes {stable_mosaic.version = 11 : i64} {
  func.func @_drop_path_kernel(%arg0: i32, %arg1: i32, %arg2: memref<2x1024xf32, #tpu.memory_space<vmem>>, %arg3: memref<2x1xf32, #tpu.memory_space<vmem>>, %arg4: memref<2x1024xf32, #tpu.memory_space<vmem>>) attributes {dimension_semantics = [#tpu.dimension_semantics<parallel>, #tpu.dimension_semantics<parallel>], iteration_bounds = array<i64: 1, 1>, scalar_prefetch = 0 : i64, scratch_operands = 0 : i64, tpu.core_type = #tpu.core_type<tc>, window_params = [{transform_indices = @transform_0, window_bounds = array<i64: 2, 1024>}, {transform_indices = @transform_1, window_bounds = array<i64: 2, 1>}, {transform_indices = @transform_2, window_bounds = array<i64: 2, 1024>}]} {
    %c0 = arith.constant 0 : index
    %c0_0 = arith.constant 0 : index
    %0 = vector.load %arg2[%c0, %c0_0] : memref<2x1024xf32, #tpu.memory_space<vmem>>, vector<2x1024xf32>
    %c0_1 = arith.constant 0 : index
    %c0_2 = arith.constant 0 : index
    %1 = vector.load %arg3[%c0_1, %c0_2] : memref<2x1xf32, #tpu.memory_space<vmem>>, vector<2x1xf32>
    %2 = vector.broadcast %1 : vector<2x1xf32> to vector<2x1024xf32>
    %3 = arith.mulf %0, %2 : vector<2x1024xf32>
    %c0_3 = arith.constant 0 : index
    %c0_4 = arith.constant 0 : index
    %4 = vector.load %arg4[%c0_3, %c0_4] : memref<2x1024xf32, #tpu.memory_space<vmem>>, vector<2x1024xf32>
    tpu.vector_store %arg4[%c0_3, %c0_4], %3 {strides = array<i32>} : memref<2x1024xf32, #tpu.memory_space<vmem>>, vector<2x1024xf32>,
    return
  }
  func.func @transform_0(%arg0: i32, %arg1: i32) -> (i32, i32) {
    %c0_i32 = arith.constant 0 : i32
    return %arg0, %arg1 : i32, i32
  }
  func.func @transform_1(%arg0: i32, %arg1: i32) -> (i32, i32) {
    %c0_i32 = arith.constant 0 : i32
    %c0_i32_0 = arith.constant 0 : i32
    return %arg0, %c0_i32 : i32, i32
  }
  func.func @transform_2(%arg0: i32, %arg1: i32) -> (i32, i32) {
    %c0_i32 = arith.constant 0 : i32
    return %arg0, %arg1 : i32, i32
  }
}

</mosaic_0001>

<bundles_post_ra>
// kernel: tpu_custom_call.1
= control target key start
LH: loop header
LB: loop body
LE: loop exit
PB: predicated region body
PF: predicated region fallthrough
CT: control target
= control target key end

     0   :  { %7 = vsyncpa [#allocation3], 0  ;;  %s135_s0 = inlined_call_operand.hbm [shape: f32[2,1024], index: 0, kind: input, shape index: {}]   ;;  %s136_s1 = inlined_call_operand.vmem [shape: f32[2,1], index: 1, kind: input, shape index: {}]   ;;  %s137_s2 = inlined_call_operand.hbm [shape: f32[2,1024], index: 2, kind: output, shape index: {}]  }
   0x1   :  { %8 = vsyncpa [#allocation4], 0  ;;  %s107_s9 = smov [#allocation2]  }
   0x2   :  { %s15_s10 = sshll.u32 %s107_s9, 4  ;;  %s16_s10 = int_to_ptr.vmem [resolvable:$true] %s15_s10 }
   0x3   :  { %s71_s11 = scalar_lea.vmem %s16_s10, 256  ;;  %p76_p1 = scmp.lt.s32.totalorder %s16_s10, %s16_s10 }
   0x4   :  { %p72_p0 = scmp.ne.s32.totalorder %s16_s10, %s71_s11  ;;  %p77_p2 = scmp.lt.s32.totalorder %s71_s11, %s71_s11 }
   0x6   :  { %p78_p3 = por %p77_p2, %p76_p1 }
   0x8   :  { %p79_p4 = pnand %p78_p3, %p72_p0 }
   0xa   :  { %82 = shalt.err (!%p79_p4)
}
   0xb   :  { %18 = dma.hbm_to_vmem [thread:$0]  %s135_s0, 256, %s16_s10, [#allocation3]  }
   0xc   :  { %103 = dma.done.wait [#allocation3], 256  }
   0xd   :  { %104 = vsyncadd [#allocation3], 4294967040  ;;  %v108_v0 = vmov 0   ;;  %v26_v1 = vld [vmem:[%s136_s1] sm:$0x3]  ;;  %v34_v4 = vlaneseq  ;;  %v25_v10 = vld [vmem:[#allocation2 + $0x8] sm:$0xff] }
   0xe   :  { %62 = vset.pattern.permute.xlu0 %v108_v0  ;;  %v109_v2 = vmov 269488144   ;;  %v24_v9 = vld [vmem:[#allocation2] sm:$0xff]  ;;  %s110_s16 = smov [#allocation5]  }
   0xf   :  { %29 = vperm.xlu0 %62, %v26_v1   ;;  %v32_v3 = vunpack.c.l.s4 %v109_v2  ;;  %v35_v6 = vshrl.u32 %v34_v4, 7  ;;  %s49_s0 = sshll.u32 %s110_s16, 4  ;;  %s50_s0 = int_to_ptr.vmem [resolvable:$true] %s49_s0 }
  0x10   :  { %s83_s17 = scalar_lea.vmem %s50_s0, 256  ;;  %p88_p6 = scmp.lt.s32.totalorder %s50_s0, %s50_s0 }
  0x11   :  { %v33_v5 = vunpack.c.0.s8 %v32_v3  ;;  %p84_p5 = scmp.ne.s32.totalorder %s50_s0, %s83_s17  ;;  %p89_p7 = scmp.lt.s32.totalorder %s83_s17, %s83_s17 }
  0x13   :  { %v36_v7 = vsub.s32 %v33_v5, %v35_v6  ;;  %p90_p8 = por %p89_p7, %p88_p6 }
  0x15   :  { %p91_p9 = pnand %p90_p8, %p84_p5 }
  0x8a   :  { %v30_v8 = vpop.permute.xlu0 %29 }
  0x8b   :  { %v37_v11 = vrot.slane %v30_v8, %v36_v7 }
  0x8d   :  { %v39_v12 = vmul.f32 %v37_v11, %v24_v9  ;;  %v40_v13 = vmul.f32 %v37_v11, %v25_v10 }
  0x8f   :  { %41 = vst [vmem:[#allocation5] sm:$0xff] %v39_v12  ;;  %42 = vst [vmem:[#allocation5 + $0x8] sm:$0xff] %v40_v13 }
  0x90   :  { %94 = shalt.err (!%p91_p9)
}
  0x91   :  { %52 = dma.vmem_to_hbm [thread:$0]  %s50_s0, 256, %s137_s2, [#allocation4]  }
  0x92   :  { %105 = dma.done.wait [#allocation4], 256  }
  0x93   :  { %106 = vsyncadd [#allocation4], 4294967040 }
  0x94   :  { %56 = vsyncpa [#allocation3], 1 }
  0x95   :  { %57 = vsyncpa [#allocation4], 1 }

</bundles_post_ra>
